<compile_context>
chip_gen: v5e
topology: v5e:2x2
jax: 0.10.0
libtpu: 0.0.40
codegen_flags: <defaults>
</compile_context>

<pallas_src>
import math

import jax
import jax.numpy as jnp
from jax.experimental import pallas as pl
from jax.experimental.pallas import tpu as pltpu


# Below this size the pallas_call dispatch / per-step overhead dominates the
# ~KBs of HBM traffic; let XLA emit (and fuse) the multiply directly.
_PALLAS_MIN_BYTES = 1 << 20          # 1 MiB


def _round_up(a, m):
    return ((a + m - 1) // m) * m


def _depthwise_scale_kernel(x_ref, w_ref, o_ref):
    # x_ref: (TM, TL) data tile; w_ref: (TM, 1) per-row scale (constant block,
    # DMA'd once and kept resident).  Broadcast multiply on the VPU; the
    # kernel is purely HBM-bandwidth bound.
    o_ref[...] = x_ref[...] * w_ref[...]


def _tpu_memory_config():
    """(target_tile_bytes, vmem_limit_bytes), TPU-generation aware.

    v5e/v6e: 128 MiB VMEM -> ~4 MiB tiles, 64 MiB scoped limit.
    v7x:      64 MiB VMEM -> ~2 MiB tiles, 32 MiB scoped limit.
    """
    vmem_cap = 64 << 20                      # conservative default (v7x-sized)
    try:
        cap = getattr(pltpu.get_tpu_info(), "vmem_capacity_bytes", None)
        if cap:
            vmem_cap = int(cap)
    except Exception:
        pass
    target_tile = max(1 << 20, min(4 << 20, vmem_cap // 32))
    vmem_limit = int(min(64 << 20, vmem_cap // 2))
    return target_tile, vmem_limit


def _select_tiles(rows, cols, chans, itemsize, target_tile_bytes):
    # Dtype-aware sublane alignment: 8 rows for f32, 16 for bf16, 32 for int8.
    min_sublane = max(8, 32 // max(1, itemsize))
    row_align = math.lcm(min_sublane, chans)

    if rows < row_align:
        # Block first dim == full array dim is always legal and avoids padding
        # a handful of rows up to lcm(8, C) (up to 8x HBM traffic for small N*C).
        tm = rows
    else:
        # tm stays a multiple of lcm(sublane, C), so every block's start row is
        # a multiple of C and one (tm, 1) weight column serves every grid step.
        cap = max(row_align,
                  (target_tile_bytes // (128 * itemsize)) // row_align * row_align)
        tm = min((rows // row_align) * row_align, cap)

    # Lane tile: as wide as the byte budget allows (no hard 2048 cap), so
    # short/wide slabs still get multi-MiB tiles and unmasked full-width vst.
    cols_full = _round_up(cols, 128)
    tl_budget = max(128, (target_tile_bytes // (tm * itemsize)) // 128 * 128)
    tl = min(cols_full, tl_budget)
    return tm, tl


def _depthwise_scale_pallas(x2d, w_per_channel, chans):
    """x2d: (R, L) slab where row r belongs to channel r % chans."""
    rows, cols = x2d.shape
    itemsize = x2d.dtype.itemsize
    target_tile_bytes, vmem_limit_bytes = _tpu_memory_config()
    tm, tl = _select_tiles(rows, cols, chans, itemsize, target_tile_bytes)

    grid_r = pl.cdiv(rows, tm)
    grid_c = pl.cdiv(cols, tl)
    # Keep >=2 steps along a parallel axis so v7x's two TensorCores can both
    # stream (neutral on single-TC v5e/v6e); only when the slab is big enough
    # that one extra ~0.35us grid step is noise.
    if grid_r * grid_c == 1 and tl >= 256 and rows * cols * itemsize >= (512 << 10):
        tl = _round_up(pl.cdiv(cols, 2), 128)
        grid_c = pl.cdiv(cols, tl)

    # One tiny (tm, 1) weight column reused by every tile: every block's start
    # row is a multiple of C (tm % C == 0), or there is only a single row block
    # starting at row 0 (tm == rows case).
    ch_of_row = jnp.arange(tm, dtype=jnp.int32) % chans
    w_col = w_per_channel.astype(x2d.dtype)[ch_of_row].reshape(tm, 1)

    return pl.pallas_call(
        _depthwise_scale_kernel,
        out_shape=jax.ShapeDtypeStruct((rows, cols), x2d.dtype),
        grid=(grid_r, grid_c),
        in_specs=[
            pl.BlockSpec((tm, tl), lambda i, j: (i, j)),
            # Constant block index -> fetched once, stays resident in VMEM.
            pl.BlockSpec((tm, 1), lambda i, j: (0, 0)),
        ],
        out_specs=pl.BlockSpec((tm, tl), lambda i, j: (i, j)),
        compiler_params=pltpu.CompilerParams(
            # No cross-iteration dependence: both axes parallel so Mosaic can
            # shard the grid across both TensorCores on v7x.
            dimension_semantics=("parallel", "parallel"),
            vmem_limit_bytes=vmem_limit_bytes,
        ),
    )(x2d, w_col)


def one_layer_conv2d_net(x, weight, *, force_pallas=False):
    """Forward pass of OneLayerConv2dNet: Conv2d(C, C, 1, groups=C, bias=False).

    x:      (N, C, H, W) float32
    weight: (C, 1, 1, 1) float32  (PyTorch depthwise-conv weight layout)
    returns (N, C, H, W) float32
    """
    n, c, h, w = x.shape
    assert weight.shape == (c, 1, 1, 1)
    w_per_channel = weight.reshape(c)

    # Tiny or lane-poor shapes: skip the custom call and let XLA fuse the scale.
    if not force_pallas and (
        x.size * x.dtype.itemsize < _PALLAS_MIN_BYTES or h * w < 128
    ):
        return x * w_per_channel.reshape(1, c, 1, 1)

    # Lane-dense 2D slab: row = (n, c) pair, cols = spatial; row scaled by
    # weight[c].
    x2d = x.reshape(n * c, h * w)
    out2d = _depthwise_scale_pallas(x2d, w_per_channel, c)
    return out2d.reshape(n, c, h, w)


def _reference(x, weight):
    # Depthwise 1x1 conv, groups == channels, no bias == per-channel scale.
    return x * weight.reshape(1, -1, 1, 1)


if __name__ == "__main__":
    key = jax.random.PRNGKey(0)
    kx, kw = jax.random.split(key)

    # Conv2d(3, 3, 1, groups=3) -> C must be 3.
    N, C, H, W = 2, 3, 16, 16
    x = jax.random.normal(kx, (N, C, H, W), dtype=jnp.float32)
    weight = jax.random.normal(kw, (C, 1, 1, 1), dtype=jnp.float32)
    ref = _reference(x, weight)

    # 1) Pallas kernel at the module's native (tiny) shape: rows=6 full-dim
    #    row block, single 256-lane tile, no padding copies.
    out = jax.block_until_ready(one_layer_conv2d_net(x, weight, force_pallas=True))
    assert out.shape == (N, C, H, W)
    assert jnp.allclose(out, ref, atol=1e-6, rtol=1e-6)

    # 2) Default dispatch at the tiny shape takes the fused-XLA fast path.
    out_small = jax.block_until_ready(one_layer_conv2d_net(x, weight))
    assert jnp.allclose(out_small, ref, atol=1e-6, rtol=1e-6)

    # 3) Larger input exercises the Pallas path with a multi-step parallel grid
    #    (rows=24, cols=16384 -> (24, 8192) tiles, grid (1, 2)).
    N2, H2, W2 = 8, 64, 256
    x2 = jax.random.normal(kx, (N2, C, H2, W2), dtype=jnp.float32)
    out2 = jax.block_until_ready(one_layer_conv2d_net(x2, weight))
    assert jnp.allclose(out2, _reference(x2, weight), atol=1e-6, rtol=1e-6)

    print("KERNEL_OK")
</pallas_src>

<mosaic_0001>
module attributes {stable_mosaic.version = 11 : i64} {
  func.func @_depthwise_scale_kernel(%arg0: i32, %arg1: i32, %arg2: memref<6x256xf32, #tpu.memory_space<vmem>>, %arg3: memref<6x1xf32, #tpu.memory_space<vmem>>, %arg4: memref<6x256xf32, #tpu.memory_space<vmem>>) attributes {dimension_semantics = [#tpu.dimension_semantics<parallel>, #tpu.dimension_semantics<parallel>], iteration_bounds = array<i64: 1, 1>, scalar_prefetch = 0 : i64, scratch_operands = 0 : i64, tpu.core_type = #tpu.core_type<tc>, window_params = [{transform_indices = @transform_0, window_bounds = array<i64: 6, 256>}, {pipeline_mode = #tpu.pipeline_mode<synchronous>, transform_indices = @transform_1, window_bounds = array<i64: 6, 1>}, {transform_indices = @transform_2, window_bounds = array<i64: 6, 256>}]} {
    %c0 = arith.constant 0 : index
    %c0_0 = arith.constant 0 : index
    %0 = vector.load %arg2[%c0, %c0_0] : memref<6x256xf32, #tpu.memory_space<vmem>>, vector<6x256xf32>
    %c0_1 = arith.constant 0 : index
    %c0_2 = arith.constant 0 : index
    %1 = vector.load %arg3[%c0_1, %c0_2] : memref<6x1xf32, #tpu.memory_space<vmem>>, vector<6x1xf32>
    %2 = vector.broadcast %1 : vector<6x1xf32> to vector<6x256xf32>
    %3 = arith.mulf %0, %2 : vector<6x256xf32>
    %c0_3 = arith.constant 0 : index
    %c0_4 = arith.constant 0 : index
    %4 = vector.load %arg4[%c0_3, %c0_4] : memref<6x256xf32, #tpu.memory_space<vmem>>, vector<6x256xf32>
    tpu.vector_store %arg4[%c0_3, %c0_4], %3 {strides = array<i32>} : memref<6x256xf32, #tpu.memory_space<vmem>>, vector<6x256xf32>,
    return
  }
  func.func @transform_0(%arg0: i32, %arg1: i32) -> (i32, i32) {
    %c0_i32 = arith.constant 0 : i32
    return %arg0, %arg1 : i32, i32
  }
  func.func @transform_1(%arg0: i32, %arg1: i32) -> (i32, i32) {
    %c0_i32 = arith.constant 0 : i32
    %c0_i32_0 = arith.constant 0 : i32
    %c0_i32_1 = arith.constant 0 : i32
    return %c0_i32, %c0_i32_0 : i32, i32
  }
  func.func @transform_2(%arg0: i32, %arg1: i32) -> (i32, i32) {
    %c0_i32 = arith.constant 0 : i32
    return %arg0, %arg1 : i32, i32
  }
}

</mosaic_0001>

<bundles_post_ra>
// kernel: tpu_custom_call.1
= control target key start
LH: loop header
LB: loop body
LE: loop exit
PB: predicated region body
PF: predicated region fallthrough
CT: control target
= control target key end

     0   :  { %7 = vsyncpa [#allocation3], 0  ;;  %s138_s0 = inlined_call_operand.hbm [shape: f32[6,256], index: 0, kind: input, shape index: {}]   ;;  %s139_s1 = inlined_call_operand.vmem [shape: f32[6,1], index: 1, kind: input, shape index: {}]   ;;  %s140_s2 = inlined_call_operand.hbm [shape: f32[6,256], index: 2, kind: output, shape index: {}]  }
   0x1   :  { %8 = vsyncpa [#allocation4], 0  ;;  %s14_s11 = sshll.u32 %s138_s0, 4  ;;  %s111_s12 = smov [#allocation2]   ;;  %s15_s11 = int_to_ptr.hbm [resolvable:$true] %s14_s11 }
   0x2   :  { %s16_s13 = sshll.u32 %s111_s12, 4  ;;  %s17_s13 = int_to_ptr.vmem [resolvable:$true] %s16_s13 }
   0x3   :  { %19 = dma.hbm_to_vmem [thread:$0]  %s15_s11, 256, %s17_s13, [#allocation3]  }
   0x4   :  { %107 = dma.done.wait [#allocation3], 256  }
   0x5   :  { %108 = vsyncadd [#allocation3], 4294967040  ;;  %v112_v0 = vmov 0   ;;  %v28_v1 = vld [vmem:[%s139_s1] sm:$0x3f]  ;;  %s113_s16 = smov [#allocation5]  }
   0x6   :  { %58 = vset.pattern.permute.xlu0 %v112_v0  ;;  %v26_v2 = vld [vmem:[#allocation2] sm:$0x3f]  ;;  %v27_v3 = vld [vmem:[#allocation2 + $0x8] sm:$0x3f]  ;;  %s43_s17 = sshll.u32 %s113_s16, 4  ;;  %s45_s19 = sshll.u32 %s140_s2, 4  ;;  %s44_s17 = int_to_ptr.vmem [resolvable:$true] %s43_s17  ;;  %s46_s19 = int_to_ptr.hbm [resolvable:$true] %s45_s19 }
   0x7   :  { %31 = vperm.xlu0 %58, %v28_v1  }
  0x79   :  { %v32_v4 = vpop.permute.xlu0 %31 }
  0x7a   :  { %v34_v5 = vmul.f32 %v32_v4, %v26_v2  ;;  %v35_v6 = vmul.f32 %v32_v4, %v27_v3 }
  0x7c   :  { %36 = vst [vmem:[#allocation5] sm:$0x3f] %v34_v5 }
  0x7d   :  { %37 = vst [vmem:[#allocation5 + $0x8] sm:$0x3f] %v35_v6 }
  0x7e   :  { %48 = dma.vmem_to_hbm [thread:$0]  %s44_s17, 256, %s46_s19, [#allocation4]  }
  0x7f   :  { %109 = dma.done.wait [#allocation4], 256  }
  0x80   :  { %110 = vsyncadd [#allocation4], 4294967040 }
  0x81   :  { %53 = vsyncpa [#allocation3], 1 }
  0x82   :  { %54 = vsyncpa [#allocation4], 1 }

</bundles_post_ra>
